<compile_context>
chip_gen: v6e
topology: v6e:2x2x1
jax: 0.10.0
libtpu: 0.0.40
codegen_flags: <defaults>
</compile_context>

<pallas_src>
import jax
import jax.numpy as jnp
from jax.experimental import pallas as pl
from jax.experimental.pallas import tpu as pltpu

_BN_EPS = 1e-5  # PyTorch BatchNorm2d default


# ----------------------------- host-side glue (im2col) -----------------------------
def _im2col_lanes(x_pad, kh, kw, h_out, w_out):
    """(N, C, Hp, W) -> (C*kh*kw, N*h_out*w_out).

    Row order (c, dh, dw) matches w.reshape(C_out, C_in*kh*kw); column order (n, ho, wo).
    """
    n, c, _, _ = x_pad.shape
    cols = []
    for dh in range(kh):
        for dw in range(kw):
            cols.append(x_pad[:, :, dh:dh + h_out, dw:dw + w_out])  # (N, C, Ho, Wo)
    p = jnp.stack(cols, axis=2)                   # (N, C, kh*kw, Ho, Wo)
    p = jnp.transpose(p, (1, 2, 0, 3, 4))         # (C, kh*kw, N, Ho, Wo)
    return p.reshape(c * kh * kw, n * h_out * w_out)


# --------------------------------- Pallas kernel ------------------------------------
def _inception_kernel(pt_ref, w_ref, sc_ref, sh_ref, out_ref):
    """One lane tile: all conv branches as ONE MXU matmul, fused BN(eval)+bias+tanh, one store."""
    acc = jnp.dot(w_ref[...], pt_ref[...], preferred_element_type=jnp.float32)
    # f32 epilogue (BN scale/shift with folded conv bias, then tanh), single unmasked store.
    out_ref[...] = jnp.tanh(acc * sc_ref[...] + sh_ref[...]).astype(out_ref.dtype)


# --------------------------------- wrapper ------------------------------------------
def inception_module(x, params, *, lane_tile_max=512):
    """x: (N, C_in, H, W) float32. params: list of branch dicts (w, b, gamma, beta, mean, var, pad)."""
    n, c_in, h, w = x.shape

    # Fold BatchNorm (eval mode) + conv bias into per-channel scale/shift (branch concat order).
    scales, shifts, couts, metas = [], [], [], []
    for p in params:
        cout, cin, kh, kw = p['w'].shape
        assert cin == c_in
        pad = int(p['pad'])
        h_out = h + 2 * pad - kh + 1   # symmetric zero-pad on H only (W is never padded)
        w_out = w - kw + 1
        metas.append((kh, kw, pad, h_out, w_out))
        scale = p['gamma'] / jnp.sqrt(p['var'] + _BN_EPS)
        shift = p['beta'] + scale * (p['b'] - p['mean'])   # conv bias folded into BN shift
        scales.append(scale)
        shifts.append(shift)
        couts.append(cout)

    # All branches must produce identical spatial output for the channel concat to be valid.
    assert len({m[3] for m in metas}) == 1 and len({m[4] for m in metas}) == 1, \
        "branch output shapes differ; channel concat would be invalid"
    h_out, w_out = metas[0][3], metas[0][4]

    # Group consecutive branches sharing (kh, kw, pad): they reuse ONE im2col patch tensor.
    groups = []
    for idx, m in enumerate(metas):
        if groups and metas[groups[-1][0]][:3] == m[:3]:
            groups[-1].append(idx)
        else:
            groups.append([idx])

    L = n * h_out * w_out
    c_total = sum(couts)

    # Per-group im2col patches (shared by merged branches), stacked along K.
    patch_blocks, k_sizes = [], []
    for g in groups:
        kh, kw, pad, _, _ = metas[g[0]]
        x_pad = jnp.pad(x, ((0, 0), (0, 0), (pad, pad), (0, 0)))
        patch_blocks.append(_im2col_lanes(x_pad, kh, kw, h_out, w_out))
        k_sizes.append(c_in * kh * kw)
    k_total = sum(k_sizes)
    patches = jnp.concatenate(patch_blocks, axis=0).astype(jnp.bfloat16)  # (K_total, L)

    # Block-diagonal weight matrix: all branches become one (C_total, K_total) matmul LHS.
    w_comb = jnp.zeros((c_total, k_total), jnp.float32)
    row_off, col_off = 0, 0
    for g, kg in zip(groups, k_sizes):
        for bi in g:
            cout = couts[bi]
            w_comb = w_comb.at[row_off:row_off + cout, col_off:col_off + kg].set(
                params[bi]['w'].reshape(cout, kg))
            row_off += cout
        col_off += kg
    w_comb = w_comb.astype(jnp.bfloat16)

    # Packed per-channel epilogue params (2 operands instead of 6 tiny ones).
    scale = jnp.concatenate(scales).reshape(c_total, 1).astype(jnp.float32)
    shift = jnp.concatenate(shifts).reshape(c_total, 1).astype(jnp.float32)

    # Lane-dense tiling: pad the (n, ho, wo) lane axis to a multiple of the lane tile (>=128).
    l_pad = ((L + 127) // 128) * 128
    lane_tile = min(lane_tile_max, l_pad)
    l_pad = ((l_pad + lane_tile - 1) // lane_tile) * lane_tile
    if l_pad != L:
        patches = jnp.pad(patches, ((0, 0), (0, l_pad - L)))

    grid = (l_pad // lane_tile,)

    out2d = pl.pallas_call(
        _inception_kernel,
        out_shape=jax.ShapeDtypeStruct((c_total, l_pad), x.dtype),
        grid=grid,
        in_specs=[
            pl.BlockSpec((k_total, lane_tile), lambda i: (0, i)),   # bf16 patches (lane tiled)
            pl.BlockSpec((c_total, k_total), lambda i: (0, 0)),     # bf16 block-diag weights
            pl.BlockSpec((c_total, 1), lambda i: (0, 0)),           # f32 BN scale
            pl.BlockSpec((c_total, 1), lambda i: (0, 0)),           # f32 BN shift (+bias)
        ],
        out_specs=pl.BlockSpec((c_total, lane_tile), lambda i: (0, i)),
        compiler_params=pltpu.CompilerParams(dimension_semantics=("parallel",)),
    )(patches, w_comb, scale, shift)

    out2d = out2d[:, :L]                                           # drop lane padding
    return out2d.reshape(c_total, n, h_out, w_out).transpose(1, 0, 2, 3)


# ------------------------------ pure-JAX reference -----------------------------------
def reference(x, params):
    outs = []
    for p in params:
        pad = p['pad']
        conv = jax.lax.conv_general_dilated(
            x, p['w'], window_strides=(1, 1), padding=((pad, pad), (0, 0)),
            dimension_numbers=('NCHW', 'OIHW', 'NCHW'))
        conv = conv + p['b'][None, :, None, None]
        bn = (conv - p['mean'][None, :, None, None]) / jnp.sqrt(p['var'][None, :, None, None] + _BN_EPS)
        bn = bn * p['gamma'][None, :, None, None] + p['beta'][None, :, None, None]
        outs.append(jnp.tanh(bn))
    return jnp.concatenate(outs, axis=1)


if __name__ == "__main__":
    key = jax.random.PRNGKey(0)

    # small shapes consistent with the module
    N, C_in = 2, 2
    sentence_length, filter_width, filter_height, filter_channel = 8, 4, 3, 6
    width = 5  # embedding-ish width axis (never padded); W_out = width - filter_height + 1

    # channel split exactly as in InceptionModule.__init__
    c1 = int(filter_channel / 3) + filter_channel - 3 * int(filter_channel / 3)
    c23 = int(filter_channel / 3)
    branch_defs = [
        (c1,  filter_width,      filter_width - 1),
        (c23, filter_width + 4,  filter_width + 1),
        (c23, sentence_length,   int((sentence_length + filter_width - 2) / 2)),
    ]

    # deterministic synthetic parameters (Conv weight/bias + BatchNorm eval-mode stats/affine)
    # TODO(synk): PyTorch BatchNorm2d in training mode uses batch statistics; eval-mode semantics used here.
    params = []
    for idx, (cout, kh, pad) in enumerate(branch_defs):
        ks = jax.random.split(jax.random.fold_in(key, idx), 6)
        params.append(dict(
            w=0.1 * jax.random.normal(ks[0], (cout, C_in, kh, filter_height), jnp.float32),
            b=0.1 * jax.random.normal(ks[1], (cout,), jnp.float32),
            gamma=1.0 + 0.1 * jax.random.normal(ks[2], (cout,), jnp.float32),
            beta=0.1 * jax.random.normal(ks[3], (cout,), jnp.float32),
            mean=0.1 * jax.random.normal(ks[4], (cout,), jnp.float32),
            var=1.0 + 0.5 * jax.random.uniform(ks[5], (cout,), jnp.float32),
            pad=pad,
        ))

    x = jax.random.normal(jax.random.fold_in(key, 100),
                          (N, C_in, sentence_length, width), jnp.float32)

    out = inception_module(x, params)
    out = jax.block_until_ready(out)

    ref = reference(x, params)
    expected_shape = (N, filter_channel,
                      sentence_length + filter_width - 1, width - filter_height + 1)
    assert out.shape == expected_shape, (out.shape, expected_shape)
    max_err = float(jnp.max(jnp.abs(out - ref)))
    assert max_err < 2e-2, f"max abs error too large: {max_err}"  # bf16 MXU inputs, f32 accum/epilogue

    print("KERNEL_OK")
</pallas_src>

<mosaic_0001>
module attributes {stable_mosaic.version = 11 : i64} {
  func.func @_inception_kernel(%arg0: i32, %arg1: memref<72x128xbf16, #tpu.memory_space<vmem>>, %arg2: memref<6x72xbf16, #tpu.memory_space<vmem>>, %arg3: memref<6x1xf32, #tpu.memory_space<vmem>>, %arg4: memref<6x1xf32, #tpu.memory_space<vmem>>, %arg5: memref<6x128xf32, #tpu.memory_space<vmem>>) attributes {dimension_semantics = [#tpu.dimension_semantics<parallel>], iteration_bounds = array<i64: 1>, scalar_prefetch = 0 : i64, scratch_operands = 0 : i64, tpu.core_type = #tpu.core_type<tc>, window_params = [{transform_indices = @transform_0, window_bounds = array<i64: 72, 128>}, {pipeline_mode = #tpu.pipeline_mode<synchronous>, transform_indices = @transform_1, window_bounds = array<i64: 6, 72>}, {pipeline_mode = #tpu.pipeline_mode<synchronous>, transform_indices = @transform_2, window_bounds = array<i64: 6, 1>}, {pipeline_mode = #tpu.pipeline_mode<synchronous>, transform_indices = @transform_3, window_bounds = array<i64: 6, 1>}, {transform_indices = @transform_4, window_bounds = array<i64: 6, 128>}]} {
    %c0 = arith.constant 0 : index
    %c0_0 = arith.constant 0 : index
    %0 = vector.load %arg2[%c0, %c0_0] : memref<6x72xbf16, #tpu.memory_space<vmem>>, vector<6x72xbf16>
    %c0_1 = arith.constant 0 : index
    %c0_2 = arith.constant 0 : index
    %1 = vector.load %arg1[%c0_1, %c0_2] : memref<72x128xbf16, #tpu.memory_space<vmem>>, vector<72x128xbf16>
    %cst = arith.constant dense<0.000000e+00> : vector<6x128xf32>
    %2 = tpu.matmul %0, %1, %cst {dimension_numbers = #tpu.dot_dimension_numbers<[1], [0], [0], [1], [0, 0, 1, 1], [], []>} : vector<6x72xbf16>, vector<72x128xbf16>, vector<6x128xf32> -> vector<6x128xf32>
    %c0_3 = arith.constant 0 : index
    %c0_4 = arith.constant 0 : index
    %3 = vector.load %arg3[%c0_3, %c0_4] : memref<6x1xf32, #tpu.memory_space<vmem>>, vector<6x1xf32>
    %4 = vector.broadcast %3 : vector<6x1xf32> to vector<6x128xf32>
    %5 = arith.mulf %2, %4 : vector<6x128xf32>
    %c0_5 = arith.constant 0 : index
    %c0_6 = arith.constant 0 : index
    %6 = vector.load %arg4[%c0_5, %c0_6] : memref<6x1xf32, #tpu.memory_space<vmem>>, vector<6x1xf32>
    %7 = vector.broadcast %6 : vector<6x1xf32> to vector<6x128xf32>
    %8 = arith.addf %5, %7 : vector<6x128xf32>
    %9 = math.tanh %8 : vector<6x128xf32>
    %c0_7 = arith.constant 0 : index
    %c0_8 = arith.constant 0 : index
    %10 = vector.load %arg5[%c0_7, %c0_8] : memref<6x128xf32, #tpu.memory_space<vmem>>, vector<6x128xf32>
    tpu.vector_store %arg5[%c0_7, %c0_8], %9 {strides = array<i32>} : memref<6x128xf32, #tpu.memory_space<vmem>>, vector<6x128xf32>,
    return
  }
  func.func @transform_0(%arg0: i32) -> (i32, i32) {
    %c0_i32 = arith.constant 0 : i32
    %c0_i32_0 = arith.constant 0 : i32
    return %c0_i32, %arg0 : i32, i32
  }
  func.func @transform_1(%arg0: i32) -> (i32, i32) {
    %c0_i32 = arith.constant 0 : i32
    %c0_i32_0 = arith.constant 0 : i32
    %c0_i32_1 = arith.constant 0 : i32
    return %c0_i32, %c0_i32_0 : i32, i32
  }
  func.func @transform_2(%arg0: i32) -> (i32, i32) {
    %c0_i32 = arith.constant 0 : i32
    %c0_i32_0 = arith.constant 0 : i32
    %c0_i32_1 = arith.constant 0 : i32
    return %c0_i32, %c0_i32_0 : i32, i32
  }
  func.func @transform_3(%arg0: i32) -> (i32, i32) {
    %c0_i32 = arith.constant 0 : i32
    %c0_i32_0 = arith.constant 0 : i32
    %c0_i32_1 = arith.constant 0 : i32
    return %c0_i32, %c0_i32_0 : i32, i32
  }
  func.func @transform_4(%arg0: i32) -> (i32, i32) {
    %c0_i32 = arith.constant 0 : i32
    %c0_i32_0 = arith.constant 0 : i32
    return %c0_i32, %arg0 : i32, i32
  }
}

</mosaic_0001>

<bundles_post_ra>
// kernel: tpu_custom_call.1
= control target key start
LH: loop header
LB: loop body
LE: loop exit
PB: predicated region body
PF: predicated region fallthrough
CT: control target
= control target key end

     0   :  { %9 = vsyncpa [#allocation3], 0  ;;  %s281_s0 = inlined_call_operand.hbm [shape: bf16[72,128], index: 0, kind: input, shape index: {}]   ;;  %s282_s1 = inlined_call_operand.vmem [shape: bf16[6,72], index: 1, kind: input, shape index: {}]   ;;  %s283_s2 = inlined_call_operand.vmem [shape: f32[6,1], index: 2, kind: input, shape index: {}]   ;;  %s284_s3 = inlined_call_operand.vmem [shape: f32[6,1], index: 3, kind: input, shape index: {}]   ;;  %s285_s4 = inlined_call_operand.hbm [shape: f32[6,128], index: 4, kind: output, shape index: {}]  }
   0x1   :  { %10 = vsyncpa [#allocation4], 0  ;;  %s234_s15 = smov [#allocation2]  }
   0x2   :  { %s16_s16 = sshll.u32 %s234_s15, 4  ;;  %s17_s16 = int_to_ptr.vmem [resolvable:$true] %s16_s16 }
   0x3   :  { %s198_s17 = scalar_lea.vmem %s17_s16, 576  ;;  %p203_p1 = scmp.lt.s32.totalorder %s17_s16, %s17_s16 }
   0x4   :  { %p199_p0 = scmp.ne.s32.totalorder %s17_s16, %s198_s17  ;;  %p204_p2 = scmp.lt.s32.totalorder %s198_s17, %s198_s17 }
   0x6   :  { %p205_p3 = por %p204_p2, %p203_p1 }
   0x8   :  { %p206_p4 = pnand %p205_p3, %p199_p0 }
   0xa   :  { %209 = shalt.err (!%p206_p4)
}
   0xb   :  { %s235_s18 = smov 64   ;;  %s236_s19 = smov 4  }
   0xc   :  { %22 = dma.hbm_to_vmem [thread:$0]  %s281_s0, 576, %s17_s16, [#allocation3], %s235_s18, %s235_s18, %s236_s19  }
   0xd   :  { %230 = dma.done.wait [#allocation3], 576  }
   0xe   :  { %231 = vsyncadd [#allocation3], 4294966720  ;;  %v237_v0 = vmov 0.0   ;;  %vm238_vm0 = vmmov 0   ;;  %v239_v1 = vmov 0   ;;  %vm74_vm1 = vcmask 1043456  }
   0xf   :  { %161 = vmatprep.subr.bf16.mxu0 %v237_v0  ;;  %171 = vmatprep.mubr.msk.bf16.mxu0 %vm238_vm0, %v237_v0  ;;  %v183_v2 = vld [vmem:[#allocation2 + $0x20] ss:$0 sps:$4 sm:$0xff]   ;;  %v184_v4 = vld [vmem:[#allocation2 + $0x18] sm:$0xff]   ;;  %v185_v6 = vld [vmem:[#allocation2 + $0x10] sm:$0xff]   ;;  %vm70_vm2 = vcmask 588800  }
  0x10   :  { %182 = vset.pattern.permute.xlu0 %v239_v1  ;;  %v76_v3 = vsel %vm74_vm1, %v183_v2, 0  ;;  %v118_v5 = vld [vmem:[%s283_s2] sm:$0x3f]  ;;  %v186_v8 = vld [vmem:[#allocation2 + $0x8] sm:$0xff]   ;;  %s240_s2 = smov [#allocation5]  }
  0x11   :  { %162 = vmatpush3.bf16.msra.mxu0 %v76_v3  ;;  %121 = vperm.xlu0 %182, %v118_v5   ;;  %v125_v7 = vld [vmem:[%s284_s3] sm:$0x3f]  ;;  %s140_s3 = sshll.u32 %s240_s2, 4  ;;  %s141_s3 = int_to_ptr.vmem [resolvable:$true] %s140_s3 }
  0x12   :  { %163 = vmatprep.subr.bf16.mxu0 %v237_v0  ;;  %v187_v9 = vld [vmem:[#allocation2] sm:$0xff]   ;;  %s210_s27 = scalar_lea.vmem %s141_s3, 128  ;;  %p215_p6 = scmp.lt.s32.totalorder %s141_s3, %s141_s3 }
  0x13   :  { %v33_v10 = vld [vmem:[%s282_s1] sm:$0x7]  ;;  %p211_p5 = scmp.ne.s32.totalorder %s141_s3, %s210_s27  ;;  %p216_p7 = scmp.lt.s32.totalorder %s210_s27, %s210_s27 }
  0x15   :  { %164 = vmatpush3.bf16.msra.mxu0 %v184_v4  ;;  %128 = vperm.xlu0 %182, %v125_v7   ;;  %p217_p8 = por %p216_p7, %p215_p6 }
  0x16   :  { %165 = vmatprep.subr.bf16.mxu0 %v237_v0 }
  0x17   :  { %p218_p9 = pnand %p217_p8, %p211_p5 }
  0x19   :  { %166 = vmatpush3.bf16.msra.mxu0 %v185_v6 }
  0x1a   :  { %167 = vmatprep.subr.bf16.mxu0 %v237_v0 }
  0x1d   :  { %168 = vmatpush3.bf16.msra.mxu0 %v186_v8 }
  0x1e   :  { %169 = vmatprep.subr.bf16.mxu0 %v237_v0 }
  0x21   :  { %170 = vmatpush3.bf16.msra.mxu0 %v187_v9 }
  0x24   :  { %172 = vmatmul.mubr.msk.bf16.vlgmr.msra.gmra.mxu0 %vm70_vm2, %v33_v10 }
  0x8c   :  { %v122_v11 = vpop.permute.xlu0 %121 }
  0x90   :  { %v129_v14 = vpop.permute.xlu0 %128 }
  0xe4   :  { %v112_v12 = vpop.f32.mrf.mxu0 }
  0xe5   :  { %v124_v13 = vmul.f32 %v122_v11, %v112_v12 }
  0xe6   :  { %v173_v15 = vpop.f32.mrf.mxu0 }
  0xe7   :  { %v131_v16 = vadd.f32 %v129_v14, %v124_v13 }
  0xe8   :  { %v115_v17 = vpop.f32.mrf.mxu0 }
  0xe9   :  { %188 = vtanh.f32 %v131_v16 }
  0xea   :  { %v174_v18 = vpop.f32.mrf.mxu0 }
  0xf6   :  { %v189_v19 = vpop.eup %188 }
  0xf7   :  { %133 = vst [vmem:[#allocation5] sm:$0x3f] %v189_v19 }
  0xf8   :  { %221 = shalt.err (!%p218_p9)
}
  0xf9   :  { %143 = dma.vmem_to_hbm [thread:$0]  %s141_s3, 128, %s285_s4, [#allocation4]  }
  0xfa   :  { %232 = dma.done.wait [#allocation4], 128  }
  0xfb   :  { %233 = vsyncadd [#allocation4], 4294967168 }
  0xfc   :  { %147 = vsyncpa [#allocation3], 1 }
  0xfd   :  { %148 = vsyncpa [#allocation4], 1 }

</bundles_post_ra>
